<compile_context>
chip_gen: v5e
topology: v5e:2x2
jax: 0.10.0
libtpu: 0.0.40
codegen_flags: <defaults>
</compile_context>

<pallas_src>
import functools

import jax
import jax.numpy as jnp
from jax import lax
from jax.experimental import pallas as pl
from jax.experimental.pallas import tpu as pltpu


def _mean_kernel(x_ref, o_ref, *scratch, n_rows, tn, inv_divisor, needs_mask):
    # x_ref: (TB, TN, TD) input tile.  o_ref: (TB, TD) output tile, resident
    # across the N grid axis.  scratch is () for float32 outputs (accumulate
    # directly into o_ref) or a single float32 (TB, TD) accumulator otherwise.
    acc_ref = scratch[0] if scratch else o_ref
    k = pl.program_id(2)
    last = pl.num_programs(2) - 1

    @pl.when(k == 0)
    def _():
        acc_ref[...] = jnp.zeros_like(acc_ref)

    def _accumulate(x):
        # Reduce over the sequence (sublane) axis, accumulating in f32.
        acc_ref[...] += jnp.sum(x, axis=1, dtype=jnp.float32)

    if needs_mask:
        # Only the padded last sequence tile needs masking.
        @pl.when(k != last)
        def _():
            _accumulate(x_ref[...])

        @pl.when(k == last)
        def _():
            seq = lax.broadcasted_iota(jnp.int32, (1, tn, 1), 1) + k * tn
            zero = jnp.zeros((), dtype=x_ref.dtype)
            _accumulate(jnp.where(seq < n_rows, x_ref[...], zero))
    else:
        _accumulate(x_ref[...])

    @pl.when(k == last)
    def _():
        if scratch:
            o_ref[...] = (acc_ref[...] * inv_divisor).astype(o_ref.dtype)
        else:
            o_ref[...] = acc_ref[...] * inv_divisor


def _choose_td(dim, batch_blocks):
    """Feature tile: lane-aligned, divides dim, and splits when it is the only
    way to get >= 2 parallel grid programs (megacore / v7x two-TC sharding)."""
    if dim % 128 != 0:
        return dim
    divisors = [d for d in range(128, dim + 1, 128) if dim % d == 0]
    need_split = batch_blocks < 2 and dim >= 256
    cap = dim
    if need_split:
        cap = min(cap, dim // 2)
    if need_split or dim > 512:
        cap = min(cap, 512)
    cands = [d for d in divisors if d <= cap]
    return max(cands) if cands else dim


def _choose_tn(n, budget_rows, align):
    """Sequence tile: multiple of the dtype's sublane packing, preferring an
    exact divisor of n (no tail mask) unless that shrinks the tile > 2x."""
    budget = max(align, (budget_rows // align) * align)
    if budget >= n:
        return n, False
    for cand in range(budget, align - 1, -align):
        if n % cand == 0:
            if cand * 2 >= budget:
                return cand, False
            break
    return budget, True


def _mean_pallas(x, *, divisor, out_dtype, block_bytes):
    b, n, d = x.shape
    itemsize = jnp.dtype(x.dtype).itemsize

    tb = b if b <= 8 else 8                      # sublane-dense output store
    batch_blocks = -(-b // tb)
    td = _choose_td(d, batch_blocks)
    align = max(8, 32 // itemsize)               # sublane packing of the dtype
    tn, needs_mask = _choose_tn(
        n, block_bytes // max(1, tb * td * itemsize), align)

    grid = (batch_blocks, -(-d // td), -(-n // tn))

    f32_out = jnp.dtype(out_dtype) == jnp.float32
    scratch_shapes = [] if f32_out else [pltpu.VMEM((tb, td), jnp.float32)]

    kernel = functools.partial(
        _mean_kernel, n_rows=n, tn=tn, inv_divisor=1.0 / divisor,
        needs_mask=needs_mask)

    # 2x double-buffered input block + output/scratch/slack; keep the limit
    # coupled to the actual block size so larger caller budgets still compile.
    block_vmem = tb * tn * td * itemsize
    vmem_limit = max(2 * block_vmem + 8 * 1024 * 1024, 32 * 1024 * 1024)
    vmem_limit = min(vmem_limit, 100 * 1024 * 1024)

    return pl.pallas_call(
        kernel,
        out_shape=jax.ShapeDtypeStruct((b, d), out_dtype),
        grid_spec=pltpu.PrefetchScalarGridSpec(
            num_scalar_prefetch=0,
            grid=grid,
            in_specs=[pl.BlockSpec((tb, tn, td), lambda i, j, k: (i, k, j))],
            out_specs=pl.BlockSpec((tb, td), lambda i, j, k: (i, j)),
            scratch_shapes=scratch_shapes,
        ),
        compiler_params=pltpu.CompilerParams(
            dimension_semantics=("parallel", "parallel", "arbitrary"),
            vmem_limit_bytes=vmem_limit,
        ),
    )(x)


def mean_encoder(x, *, block_bytes=12 * 1024 * 1024):
    """Pallas implementation of MeanEncoder.forward: z = x.mean(axis=1)."""
    b, n, dim = x.shape

    # Lane-dense packing for small feature dims: fold r sequence steps into the
    # lane dimension so vregs and the output store use all 128 lanes; finish
    # the tiny r-way add (and final cast) outside the kernel.
    if dim < 128 and 128 % dim == 0 and (128 // dim) > 1 and n % (128 // dim) == 0:
        r = 128 // dim
        xp = x.reshape(b, n // r, r * dim)          # contiguous row-major view
        zp = _mean_pallas(xp, divisor=n, out_dtype=jnp.float32,
                          block_bytes=block_bytes)
        return zp.reshape(b, r, dim).sum(axis=1).astype(x.dtype)

    # TODO(synk): dims < 128 that do not divide 128 (or N % r != 0) still take
    # the lane-sparse path below with masked output stores.
    return _mean_pallas(x, divisor=n, out_dtype=x.dtype, block_bytes=block_bytes)


if __name__ == "__main__":
    key = jax.random.PRNGKey(0)

    # Small case matching the module's forward (batch, seq, hidden):
    # exercises the lane-packed (dim < 128) path with f32 direct accumulation.
    b, N, dim = 2, 8, 32
    x = jax.random.normal(key, (b, N, dim), dtype=jnp.float32)
    z = jax.block_until_ready(mean_encoder(x))
    z_ref = jnp.mean(x, axis=1)
    assert z.shape == (b, dim), z.shape
    assert jnp.allclose(z, z_ref, atol=1e-5, rtol=1e-5), "mismatch vs reference"

    # Tiled-N / masked-last-step / bf16 scratch path with a tiny block budget
    # (also exercises the dim split that keeps >= 2 parallel grid programs).
    key2 = jax.random.PRNGKey(0)
    x2 = jax.random.normal(key2, (4, 520, 256), dtype=jnp.bfloat16)
    z2 = jax.block_until_ready(mean_encoder(x2, block_bytes=64 * 1024))
    z2_ref = jnp.mean(x2.astype(jnp.float32), axis=1).astype(jnp.bfloat16)
    assert z2.shape == (4, 256), z2.shape
    assert jnp.allclose(z2.astype(jnp.float32), z2_ref.astype(jnp.float32),
                        atol=2e-2, rtol=2e-2), "mismatch vs bf16 reference"

    print("KERNEL_OK")
</pallas_src>

<mosaic_0001>
module attributes {stable_mosaic.version = 11 : i64} {
  func.func @_mean_kernel(%arg0: i32, %arg1: i32, %arg2: i32, %arg3: memref<2x2x128xf32, #tpu.memory_space<vmem>>, %arg4: memref<2x128xf32, #tpu.memory_space<vmem>>) attributes {dimension_semantics = [#tpu.dimension_semantics<parallel>, #tpu.dimension_semantics<parallel>, #tpu.dimension_semantics<arbitrary>], iteration_bounds = array<i64: 1, 1, 1>, scalar_prefetch = 0 : i64, scratch_operands = 0 : i64, tpu.core_type = #tpu.core_type<tc>, window_params = [{transform_indices = @transform_0, window_bounds = array<i64: 2, 2, 128>}, {transform_indices = @transform_1, window_bounds = array<i64: 2, 128>}]} {
    %c0_i32 = arith.constant 0 : i32
    %0 = arith.cmpi eq, %arg2, %c0_i32 : i32
    %1 = arith.extui %0 : i1 to i32
    %c0_i32_0 = arith.constant 0 : i32
    %2 = arith.cmpi ne, %1, %c0_i32_0 : i32
    scf.if %2 {
      %cst_9 = arith.constant 0.000000e+00 : f32
      %11 = vector.broadcast %cst_9 : f32 to vector<2x128xf32>
      %c0_10 = arith.constant 0 : index
      %c0_11 = arith.constant 0 : index
      %12 = vector.load %arg4[%c0_10, %c0_11] : memref<2x128xf32, #tpu.memory_space<vmem>>, vector<2x128xf32>
      tpu.vector_store %arg4[%c0_10, %c0_11], %11 {strides = array<i32>} : memref<2x128xf32, #tpu.memory_space<vmem>>, vector<2x128xf32>,
    } else {
    }
    %c0 = arith.constant 0 : index
    %c0_1 = arith.constant 0 : index
    %c0_2 = arith.constant 0 : index
    %3 = vector.load %arg3[%c0, %c0_1, %c0_2] : memref<2x2x128xf32, #tpu.memory_space<vmem>>, vector<2x2x128xf32>
    %c0_3 = arith.constant 0 : index
    %c0_4 = arith.constant 0 : index
    %4 = vector.load %arg4[%c0_3, %c0_4] : memref<2x128xf32, #tpu.memory_space<vmem>>, vector<2x128xf32>
    %cst = arith.constant dense<0.000000e+00> : vector<2x128xf32>
    %5 = vector.multi_reduction <add>, %3, %cst [1] : vector<2x2x128xf32> to vector<2x128xf32>
    %6 = arith.addf %4, %5 : vector<2x128xf32>
    %c0_5 = arith.constant 0 : index
    %c0_6 = arith.constant 0 : index
    %7 = vector.load %arg4[%c0_5, %c0_6] : memref<2x128xf32, #tpu.memory_space<vmem>>, vector<2x128xf32>
    tpu.vector_store %arg4[%c0_5, %c0_6], %6 {strides = array<i32>} : memref<2x128xf32, #tpu.memory_space<vmem>>, vector<2x128xf32>,
    %c0_i32_7 = arith.constant 0 : i32
    %8 = arith.cmpi eq, %arg2, %c0_i32_7 : i32
    %9 = arith.extui %8 : i1 to i32
    %c0_i32_8 = arith.constant 0 : i32
    %10 = arith.cmpi ne, %9, %c0_i32_8 : i32
    scf.if %10 {
      %c0_9 = arith.constant 0 : index
      %c0_10 = arith.constant 0 : index
      %11 = vector.load %arg4[%c0_9, %c0_10] : memref<2x128xf32, #tpu.memory_space<vmem>>, vector<2x128xf32>
      %cst_11 = arith.constant 1.250000e-01 : f32
      %12 = vector.broadcast %cst_11 : f32 to vector<2x128xf32>
      %13 = arith.mulf %11, %12 : vector<2x128xf32>
      %c0_12 = arith.constant 0 : index
      %c0_13 = arith.constant 0 : index
      %14 = vector.load %arg4[%c0_12, %c0_13] : memref<2x128xf32, #tpu.memory_space<vmem>>, vector<2x128xf32>
      tpu.vector_store %arg4[%c0_12, %c0_13], %13 {strides = array<i32>} : memref<2x128xf32, #tpu.memory_space<vmem>>, vector<2x128xf32>,
    } else {
    }
    return
  }
  func.func @transform_0(%arg0: i32, %arg1: i32, %arg2: i32) -> (i32, i32, i32) {
    %c0_i32 = arith.constant 0 : i32
    return %arg0, %arg2, %arg1 : i32, i32, i32
  }
  func.func @transform_1(%arg0: i32, %arg1: i32, %arg2: i32) -> (i32, i32) {
    %c0_i32 = arith.constant 0 : i32
    return %arg0, %arg1 : i32, i32
  }
}

</mosaic_0001>

<bundles_post_ra>
// kernel: tpu_custom_call.1
= control target key start
LH: loop header
LB: loop body
LE: loop exit
PB: predicated region body
PF: predicated region fallthrough
CT: control target
= control target key end

     0   :  { %6 = vsyncpa [#allocation3], 0  ;;  %s156_s0 = inlined_call_operand.hbm [shape: f32[2,2,128], index: 0, kind: input, shape index: {}]   ;;  %s157_s1 = inlined_call_operand.hbm [shape: f32[2,128], index: 1, kind: output, shape index: {}]  }
   0x1   :  { %7 = vsyncpa [#allocation4], 0  ;;  %s12_s8 = sshll.u32 %s156_s0, 4  ;;  %s135_s9 = smov [#allocation2]   ;;  %s13_s8 = int_to_ptr.hbm [resolvable:$true] %s12_s8 }
   0x2   :  { %s14_s10 = sshll.u32 %s135_s9, 4  ;;  %s136_s11 = smov 32   ;;  %s15_s10 = int_to_ptr.vmem [resolvable:$true] %s14_s10 }
   0x3   :  { %s137_s12 = smov 2  }
   0x4   :  { %20 = dma.hbm_to_vmem [thread:$0]  %s13_s8, 64, %s15_s10, [#allocation3], %s136_s11, %s136_s11, %s137_s12  }
   0x5   :  { %131 = dma.done.wait [#allocation3], 64  }
   0x6   :  { %132 = vsyncadd [#allocation3], 4294967232  ;;  %v138_v0 = vmov 0.0   ;;  %vm33_vm0 = vcmask 1041408   ;;  %v30_v1 = vld [vmem:[#allocation2] sm:$0x3] }
   0x7   :  { %29 = vst [vmem:[#allocation5] sm:$0x3] %v138_v0  ;;  %v31_v2 = vld [vmem:[#allocation2 + $0x2] sm:$0x3]  ;;  %v34_v3 = vsel %vm33_vm0, %v30_v1, 0.0  ;;  %vm50_vm1 = vcmask 1041409  }
   0x8   :  { %v41_v4 = vsel %vm33_vm0, %v31_v2, 0.0  ;;  %v35_v5 = vrot.slane %v34_v3, 4  ;;  %s139_s0 = smov [#allocation5]   ;;  %s68_s16 = sshll.u32 %s157_s1, 4  ;;  %s69_s16 = int_to_ptr.hbm [resolvable:$true] %s68_s16 }
   0x9   :  { %v42_v6 = vrot.slane %v41_v4, 4  ;;  %s66_s13 = sshll.u32 %s139_s0, 4  ;;  %s67_s13 = int_to_ptr.vmem [resolvable:$true] %s66_s13 }
   0xa   :  { %v36_v7 = vadd.f32 %v35_v5, %v34_v3 }
   0xb   :  { %v43_v8 = vadd.f32 %v42_v6, %v41_v4 }
   0xc   :  { %v37_v9 = vrot.slane %v36_v7, 2 }
   0xd   :  { %v44_v10 = vrot.slane %v43_v8, 2 }
   0xe   :  { %v38_v11 = vadd.f32 %v37_v9, %v36_v7  ;;  %v32_v15 = vld [vmem:[#allocation5] sm:$0x3] }
   0xf   :  { %v45_v12 = vadd.f32 %v44_v10, %v43_v8 }
  0x10   :  { %v39_v13 = vrot.slane %v38_v11, 1 }
  0x11   :  { %v46_v14 = vrot.slane %v45_v12, 1 }
  0x12   :  { %v40_v16 = vadd.f32 %v39_v13, %v38_v11 }
  0x13   :  { %v47_v17 = vadd.f32 %v46_v14, %v45_v12 }
  0x15   :  { %v51_v18 = vsel %vm50_vm1, %v47_v17, %v40_v16 }
  0x16   :  { %v53_v19 = vadd.f32 %v51_v18, %v32_v15 }
  0x18   :  { %54 = vst [vmem:[#allocation5] sm:$0x3] %v53_v19 }
  0x1f   :  { %v58_v20 = vld [vmem:[#allocation5] sm:$0x3] }
  0x20   :  { %v59_v21 = vmul.f32 0.125, %v58_v20 }
  0x22   :  { %60 = vst [vmem:[#allocation5] sm:$0x3] %v59_v21 }
  0x23   :  { %71 = dma.vmem_to_hbm [thread:$0]  %s67_s13, 32, %s69_s16, [#allocation4]  }
  0x24   :  { %133 = dma.done.wait [#allocation4], 32  }
  0x25   :  { %134 = vsyncadd [#allocation4], 4294967264 }
  0x26   :  { %76 = vsyncpa [#allocation3], 1 }
  0x27   :  { %77 = vsyncpa [#allocation4], 1 }

</bundles_post_ra>
